<compile_context>
chip_gen: v7x
topology: tpu7x:2x2x1
jax: 0.10.0
libtpu: 0.0.40
codegen_flags: <defaults>
</compile_context>

<pallas_src>
import jax
import jax.numpy as jnp
from jax.experimental import pallas as pl


NUM_CLASSES = 20
GRID_SIZE = 7
BBOX_PER_CELL = 2
OUTPUT_SIZE = BBOX_PER_CELL * 5 + NUM_CLASSES  # 30
C_IN = 3
LANE = 128


def _conv1x1_kernel(x_ref, w_ref, b_ref, o_ref):
    # x_ref: (C_in, N_pad)      lanes carry the fused B*HW axis (padded to 128 mult.)
    # w_ref: (C_in, C_out, 1)   w_ref[k] == conv weight column k, shape (C_out, 1)
    # b_ref: (C_out, 1)         broadcasts along the lane (B*HW) axis
    # o_ref: (C_out, N_pad)
    x = x_ref[...]                                   # (C_in, N_pad)

    # K == 3 -> three VPU broadcast-FMAs; no MXU fill/drain latency.
    acc = w_ref[0] * x[0:1, :] + b_ref[...]          # (C_out, N_pad) f32
    for k in range(1, C_IN):
        acc = acc + w_ref[k] * x[k:k + 1, :]

    o_ref[...] = acc.astype(o_ref.dtype)


def yolo_forward(x, weight, bias):
    """x: (B, 3, H, W) f32, weight: (C_out, 3), bias: (C_out,).

    Returns (B, grid, grid, output_size), matching PyTorch conv -> .view exactly.
    """
    B, C, H, W = x.shape
    assert C == C_IN
    HW = H * W
    assert HW * OUTPUT_SIZE == GRID_SIZE * GRID_SIZE * OUTPUT_SIZE  # .view validity
    N = B * HW
    n_pad = ((N + LANE - 1) // LANE) * LANE

    # Layout plumbing (wrapper side): (B, C, HW) -> (C, B*HW), pad lanes to 128 mult.
    x_cn = jnp.transpose(x.reshape(B, C, HW), (1, 0, 2)).reshape(C, N)
    x_cn = jnp.pad(x_cn, ((0, 0), (0, n_pad - N)))
    w_cols = jnp.transpose(weight, (1, 0)).reshape(C_IN, OUTPUT_SIZE, 1)
    bias2d = bias.reshape(OUTPUT_SIZE, 1)

    out = pl.pallas_call(
        _conv1x1_kernel,
        out_shape=jax.ShapeDtypeStruct((OUTPUT_SIZE, n_pad), x.dtype),
        in_specs=[
            pl.BlockSpec((C_IN, n_pad), lambda: (0, 0)),
            pl.BlockSpec((C_IN, OUTPUT_SIZE, 1), lambda: (0, 0, 0)),
            pl.BlockSpec((OUTPUT_SIZE, 1), lambda: (0, 0)),
        ],
        out_specs=pl.BlockSpec((OUTPUT_SIZE, n_pad), lambda: (0, 0)),
    )(x_cn, w_cols, bias2d)

    # (C_out, B*HW) -> NCHW (B, C_out, HW), then torch-style raw .view(B, 7, 7, 30).
    out_nchw = jnp.transpose(out[:, :N].reshape(OUTPUT_SIZE, B, HW), (1, 0, 2))
    return out_nchw.reshape(B, GRID_SIZE, GRID_SIZE, OUTPUT_SIZE)


if __name__ == "__main__":
    key = jax.random.PRNGKey(0)
    kx, kw, kb = jax.random.split(key, 3)

    # Input must be (B, 3, 7, 7) for the .view() to be valid (7*7*30 elems per batch).
    B = 2
    x = jax.random.normal(kx, (B, C_IN, GRID_SIZE, GRID_SIZE), dtype=jnp.float32)

    # Deterministic parameters (Conv2d(3, 30, kernel_size=1) shapes).
    weight = jax.random.normal(kw, (OUTPUT_SIZE, C_IN), dtype=jnp.float32) * 0.1
    bias = jax.random.normal(kb, (OUTPUT_SIZE,), dtype=jnp.float32) * 0.1

    out = jax.block_until_ready(yolo_forward(x, weight, bias))

    # Reference check in plain JAX (1x1 conv == einsum over the channel dim).
    ref_nchw = jnp.einsum("oc,bchw->bohw", weight, x) + bias[None, :, None, None]
    ref = ref_nchw.reshape(B, GRID_SIZE, GRID_SIZE, OUTPUT_SIZE)
    assert out.shape == (B, GRID_SIZE, GRID_SIZE, OUTPUT_SIZE)
    assert jnp.allclose(out, ref, atol=1e-5, rtol=1e-5)

    print("KERNEL_OK")
</pallas_src>

<mosaic_0001>
module attributes {stable_mosaic.version = 11 : i64} {
  func.func @_conv1x1_kernel(%arg0: memref<3x128xf32, #tpu.memory_space<vmem>>, %arg1: memref<3x30x1xf32, #tpu.memory_space<vmem>>, %arg2: memref<30x1xf32, #tpu.memory_space<vmem>>, %arg3: memref<30x128xf32, #tpu.memory_space<vmem>>) attributes {dimension_semantics = [], scalar_prefetch = 0 : i64, scratch_operands = 0 : i64, tpu.core_type = #tpu.core_type<tc>} {
    %c0 = arith.constant 0 : index
    %c0_0 = arith.constant 0 : index
    %0 = vector.load %arg0[%c0, %c0_0] : memref<3x128xf32, #tpu.memory_space<vmem>>, vector<3x128xf32>
    %c0_1 = arith.constant 0 : index
    %c0_2 = arith.constant 0 : index
    %c0_3 = arith.constant 0 : index
    %1 = vector.load %arg1[%c0_1, %c0_2, %c0_3] : memref<3x30x1xf32, #tpu.memory_space<vmem>>, vector<1x30x1xf32>
    %2 = vector.shape_cast %1 : vector<1x30x1xf32> to vector<30x1xf32>
    %3 = vector.extract_strided_slice %0 {offsets = [0, 0], sizes = [1, 128], strides = [1, 1]} : vector<3x128xf32> to vector<1x128xf32>
    %4 = vector.broadcast %2 : vector<30x1xf32> to vector<30x128xf32>
    %5 = vector.broadcast %3 : vector<1x128xf32> to vector<30x128xf32>
    %6 = arith.mulf %4, %5 : vector<30x128xf32>
    %c0_4 = arith.constant 0 : index
    %c0_5 = arith.constant 0 : index
    %7 = vector.load %arg2[%c0_4, %c0_5] : memref<30x1xf32, #tpu.memory_space<vmem>>, vector<30x1xf32>
    %8 = vector.broadcast %7 : vector<30x1xf32> to vector<30x128xf32>
    %9 = arith.addf %6, %8 : vector<30x128xf32>
    %c1 = arith.constant 1 : index
    %c0_6 = arith.constant 0 : index
    %c0_7 = arith.constant 0 : index
    %10 = vector.load %arg1[%c1, %c0_6, %c0_7] : memref<3x30x1xf32, #tpu.memory_space<vmem>>, vector<1x30x1xf32>
    %11 = vector.shape_cast %10 : vector<1x30x1xf32> to vector<30x1xf32>
    %12 = vector.extract_strided_slice %0 {offsets = [1, 0], sizes = [1, 128], strides = [1, 1]} : vector<3x128xf32> to vector<1x128xf32>
    %13 = vector.broadcast %11 : vector<30x1xf32> to vector<30x128xf32>
    %14 = vector.broadcast %12 : vector<1x128xf32> to vector<30x128xf32>
    %15 = arith.mulf %13, %14 : vector<30x128xf32>
    %16 = arith.addf %9, %15 : vector<30x128xf32>
    %c2 = arith.constant 2 : index
    %c0_8 = arith.constant 0 : index
    %c0_9 = arith.constant 0 : index
    %17 = vector.load %arg1[%c2, %c0_8, %c0_9] : memref<3x30x1xf32, #tpu.memory_space<vmem>>, vector<1x30x1xf32>
    %18 = vector.shape_cast %17 : vector<1x30x1xf32> to vector<30x1xf32>
    %19 = vector.extract_strided_slice %0 {offsets = [2, 0], sizes = [1, 128], strides = [1, 1]} : vector<3x128xf32> to vector<1x128xf32>
    %20 = vector.broadcast %18 : vector<30x1xf32> to vector<30x128xf32>
    %21 = vector.broadcast %19 : vector<1x128xf32> to vector<30x128xf32>
    %22 = arith.mulf %20, %21 : vector<30x128xf32>
    %23 = arith.addf %16, %22 : vector<30x128xf32>
    %c0_10 = arith.constant 0 : index
    %c0_11 = arith.constant 0 : index
    %24 = vector.load %arg3[%c0_10, %c0_11] : memref<30x128xf32, #tpu.memory_space<vmem>>, vector<30x128xf32>
    tpu.vector_store %arg3[%c0_10, %c0_11], %23 {strides = array<i32>} : memref<30x128xf32, #tpu.memory_space<vmem>>, vector<30x128xf32>,
    return
  }
}

</mosaic_0001>

<bundles_post_ra>
// kernel: tpu_custom_call.1
= control target key start
LH: loop header
LB: loop body
LE: loop exit
PB: predicated region body
PF: predicated region fallthrough
CT: control target
= control target key end

     0   :  { %v208_v2 = vmov 0   ;;  %s295_s0 = inlined_call_operand.vmem [shape: f32[3,128], index: 0, kind: input, shape index: {}]   ;;  %s296_s1 = inlined_call_operand.vmem [shape: f32[3,30,1], index: 1, kind: input, shape index: {}]   ;;  %s297_s2 = inlined_call_operand.vmem [shape: f32[30,1], index: 2, kind: input, shape index: {}]   ;;  %s298_s3 = inlined_call_operand.hbm [shape: f32[30,128], index: 3, kind: output, shape index: {}]  }
   0x1   :  { %v18_v0 = vld [vmem:[%s296_s1 + $0x10] sm:$0xff]  ;;  %v16_v1 = vld [vmem:[%s296_s1] sm:$0xff]  ;;  %183 = vset.pattern.permute.xlu1 %v208_v2  ;;  %182 = vset.pattern.permute.xlu0 %v208_v2  ;;  %v19_v3 = vld [vmem:[%s296_s1 + $0x18] sm:$0x3f] }
   0x2   :  { %32 = vperm.xlu1 %183, %v18_v0   ;;  %22 = vperm.xlu0 %182, %v16_v1   ;;  %v17_v4 = vld [vmem:[%s296_s1 + $0x8] sm:$0xff] }
   0x3   :  { %8 = vsyncpa [#allocation3], 0  ;;  %v49_v5 = vld [vmem:[%s297_s2 + $0x8] sm:$0xff]  ;;  %v48_v6 = vld [vmem:[%s297_s2] sm:$0xff]  ;;  %v40_v19 = vlaneseq }
   0x4   :  { %v51_v7 = vld [vmem:[%s297_s2 + $0x18] sm:$0x3f]  ;;  %v50_v8 = vld [vmem:[%s297_s2 + $0x10] sm:$0xff]  ;;  %v171_v9 = vld [vmem:[%s296_s1 + $0x28] sm:$0xff] }
   0x5   :  { %v170_v10 = vld [vmem:[%s296_s1 + $0x20] sm:$0xff]  ;;  %v173_v11 = vld [vmem:[%s296_s1 + $0x38] sm:$0x3f]  ;;  %v172_v12 = vld [vmem:[%s296_s1 + $0x30] sm:$0xff]  ;;  %v41_v22 = vshrl.u32 %v40_v19, 7 }
   0x6   :  { %37 = vperm.xlu1 %183, %v19_v3   ;;  %27 = vperm.xlu0 %182, %v17_v4   ;;  %v175_v13 = vld [vmem:[%s296_s1 + $0x48] sm:$0xff]  ;;  %v174_v14 = vld [vmem:[%s296_s1 + $0x40] sm:$0xff]  ;;  %v177_v15 = vld [vmem:[%s296_s1 + $0x58] sm:$0x3f] }
   0x7   :  { %v176_v16 = vld [vmem:[%s296_s1 + $0x50] sm:$0xff]  ;;  %v42_v25 = vsub.s32 0, %v41_v22  ;;  %v103_v28 = vsub.s32 1, %v41_v22  ;;  %v15_v29 = vld [vmem:[%s295_s0] sm:$0x7]  ;;  %v140_v34 = vsub.s32 2, %v41_v22 }
   0x8   :  { %s209_s0 = smov [#allocation2]  }
   0x9   :  { %v43_v30 = vrot.slane %v15_v29, %v42_v25  ;;  %v104_v32 = vrot.slane %v15_v29, %v103_v28  ;;  %v141_v41 = vrot.slane %v15_v29, %v140_v34  ;;  %s159_s1 = sshll.u32 %s209_s0, 4  ;;  %s160_s1 = int_to_ptr.vmem [resolvable:$true] %s159_s1 }
   0xa   :  { %59 = vperm.xlu1 %183, %v49_v5   ;;  %54 = vperm.xlu0 %182, %v48_v6   ;;  %s184_s18 = scalar_lea.vmem %s160_s1, 512  ;;  %p189_p1 = scmp.lt.s32.totalorder %s160_s1, %s160_s1 }
   0xb   :  { %p185_p0 = scmp.ne.s32.totalorder %s160_s1, %s184_s18  ;;  %p190_p2 = scmp.lt.s32.totalorder %s184_s18, %s184_s18 }
   0xd   :  { %p191_p3 = por %p190_p2, %p189_p1 }
   0xe   :  { %69 = vperm.xlu1 %183, %v51_v7   ;;  %64 = vperm.xlu0 %182, %v50_v8  }
   0xf   :  { %p192_p4 = pnand %p191_p3, %p185_p0 }
  0x12   :  { %88 = vperm.xlu1 %183, %v171_v9   ;;  %83 = vperm.xlu0 %182, %v170_v10  }
  0x16   :  { %98 = vperm.xlu1 %183, %v173_v11   ;;  %93 = vperm.xlu0 %182, %v172_v12  }
  0x1a   :  { %125 = vperm.xlu1 %183, %v175_v13   ;;  %120 = vperm.xlu0 %182, %v174_v14  }
  0x1e   :  { %135 = vperm.xlu1 %183, %v177_v15   ;;  %130 = vperm.xlu0 %182, %v176_v16  }
  0x81   :  { %v33_v17 = vpop.permute.xlu1 %32  ;;  %v23_v18 = vpop.permute.xlu0 %22 }
  0x82   :  { %v44_v35 = vmul.f32 %v43_v30, %v23_v18  ;;  %v46_v44 = vmul.f32 %v43_v30, %v33_v17 }
  0x85   :  { %v38_v20 = vpop.permute.xlu1 %37  ;;  %v28_v21 = vpop.permute.xlu0 %27 }
  0x86   :  { %v45_v36 = vmul.f32 %v43_v30, %v28_v21  ;;  %v47_v45 = vmul.f32 %v43_v30, %v38_v20 }
  0x89   :  { %v60_v23 = vpop.permute.xlu1 %59  ;;  %v55_v24 = vpop.permute.xlu0 %54 }
  0x8a   :  { %v73_v42 = vadd.f32 %v60_v23, %v45_v36  ;;  %v72_v43 = vadd.f32 %v55_v24, %v44_v35 }
  0x8d   :  { %v70_v26 = vpop.permute.xlu1 %69  ;;  %v65_v27 = vpop.permute.xlu0 %64 }
  0x8e   :  { %v75_v54 = vadd.f32 %v70_v26, %v47_v45  ;;  %v74_v55 = vadd.f32 %v65_v27, %v46_v44 }
  0x91   :  { %v89_v31 = vpop.permute.xlu1 %88  ;;  %v84_v33 = vpop.permute.xlu0 %83 }
  0x92   :  { %v106_v37 = vmul.f32 %v104_v32, %v89_v31  ;;  %v105_v38 = vmul.f32 %v104_v32, %v84_v33 }
  0x94   :  { %v110_v46 = vadd.f32 %v106_v37, %v73_v42  ;;  %v109_v47 = vadd.f32 %v105_v38, %v72_v43 }
  0x95   :  { %v99_v39 = vpop.permute.xlu1 %98  ;;  %v94_v40 = vpop.permute.xlu0 %93 }
  0x96   :  { %v108_v50 = vmul.f32 %v104_v32, %v99_v39  ;;  %v107_v51 = vmul.f32 %v104_v32, %v94_v40 }
  0x98   :  { %v112_v60 = vadd.f32 %v108_v50, %v75_v54  ;;  %v111_v61 = vadd.f32 %v107_v51, %v74_v55 }
  0x99   :  { %v126_v48 = vpop.permute.xlu1 %125  ;;  %v121_v49 = vpop.permute.xlu0 %120 }
  0x9a   :  { %v143_v52 = vmul.f32 %v141_v41, %v126_v48  ;;  %v142_v53 = vmul.f32 %v141_v41, %v121_v49 }
  0x9c   :  { %v147_v56 = vadd.f32 %v143_v52, %v110_v46  ;;  %v146_v57 = vadd.f32 %v142_v53, %v109_v47 }
  0x9d   :  { %v136_v58 = vpop.permute.xlu1 %135  ;;  %v131_v59 = vpop.permute.xlu0 %130 }
  0x9e   :  { %151 = vst [vmem:[#allocation2 + $0x8] sm:$0xff] %v147_v56  ;;  %150 = vst [vmem:[#allocation2] sm:$0xff] %v146_v57  ;;  %v145_v62 = vmul.f32 %v141_v41, %v136_v58  ;;  %v144_v63 = vmul.f32 %v141_v41, %v131_v59 }
  0xa0   :  { %v149_v0 = vadd.f32 %v145_v62, %v112_v60  ;;  %v148_v1 = vadd.f32 %v144_v63, %v111_v61 }
  0xa2   :  { %153 = vst [vmem:[#allocation2 + $0x18] sm:$0x3f] %v149_v0  ;;  %152 = vst [vmem:[#allocation2 + $0x10] sm:$0xff] %v148_v1 }
  0xa3   :  { %195 = shalt.err (!%p192_p4)
}
  0xa4   :  { %s196_s21 = scalar_lea.hbm %s298_s3, 512 }
  0xa5   :  { %p197_p5 = scmp.ne.s32.totalorder %s298_s3, %s196_s21  ;;  %p200_p6 = scmp.lt.u32.totalorder %s196_s21, %s298_s3 }
  0xa7   :  { %p202_p7 = pnand %p200_p6, %p197_p5 }
  0xa9   :  { %205 = shalt.err (!%p202_p7)
}
  0xaa   :  { %s210_s26 = smov 128   ;;  %s211_s27 = smov 8  }
  0xab   :  { %165 = dma.vmem_to_hbm [thread:$0]  %s160_s1, 512, %s298_s3, [#allocation3], %s210_s26, %s210_s26, %s211_s27  }
  0xac   :  { %206 = dma.done.wait [#allocation3], 512  }
  0xad   :  { %207 = vsyncadd [#allocation3], 4294966784 }
  0xae   :  { %169 = vsyncpa [#allocation3], 1 }

</bundles_post_ra>
